<compile_context>
chip_gen: v7x
topology: tpu7x:2x2x1
jax: 0.10.0
libtpu: 0.0.40
codegen_flags: <defaults>
</compile_context>

<pallas_src>
import numpy as np
import jax
import jax.numpy as jnp
from jax.experimental import pallas as pl
from jax.experimental.pallas import tpu as pltpu

# ----------------------------- problem sizes --------------------------------
BS = 2                         # batch size
N_AGENT = 4                    # num_agent
NUM_USER = 2                   # args.num_user
F_PER_USER = 4                 # per-user feature width
NODE_FEAT = NUM_USER * F_PER_USER   # 8  node_feature_size
EDGE_FEAT = NUM_USER * F_PER_USER   # 8  edge_feature_size
HIDDEN = 16                    # hidden_state_size (x_last / output width)
CONV_OUT = 4                   # conv1: Conv2d(2, CONV_OUT, kernel_size=(1,1))
P = NUM_USER * F_PER_USER      # flattened spatial size per channel (8)
Y_DIM = CONV_OUT * P           # flattened conv output per edge (32)
MLP1_HID = 64
EMB = 32                       # mlp1 output width == aggregated embedding width
MLP2_HID = 64
LAYER_IDX = 2                  # > 1: x_last used both in local_embedding & update
NUM_EDGE = N_AGENT * (N_AGENT - 1)   # 12: fully connected directed, no self loops
DEG = N_AGENT - 1              # incoming edges per agent
E_TOTAL = BS * NUM_EDGE        # 24 row-stacked edge rows (slot-major order)
N_TOTAL = BS * N_AGENT         # 8  row-stacked agent rows

# -------------------------- weight-slab row layout ---------------------------
W_COLS = 64                              # common lane width (max of all widths)
R_CONV = 0                               # (2*P, Y_DIM)      rows   0:16
R_W1A = R_CONV + 2 * P                   # (48, 64)          rows  16:64
R_W1B = R_W1A + (Y_DIM + HIDDEN)         # (64, 32)          rows  64:128
R_W2A = R_W1B + MLP1_HID                 # (56, 64)          rows 128:184
R_W2B = R_W2A + (NODE_FEAT + HIDDEN + EMB)   # (64, 16)      rows 184:248
R_BCONV = R_W2B + MLP2_HID               # bias rows 248..252
R_B1A = R_BCONV + 1
R_B1B = R_B1A + 1
R_B2A = R_B1B + 1
R_B2B = R_B2A + 1
W_ROWS = 256                             # pad to multiple of 8


# ------------------------------- kernel -------------------------------------
def auto_igconv_kernel(edge_ref, agent_ref, w_ref, alpha_ref, out_ref):
  edge = edge_ref[...]                                    # (E_TOTAL, 32)
  ne = edge[:, 0:2 * P]                                   # [node_j | edge_f]
  state_j = edge[:, 2 * P:2 * P + HIDDEN]                 # (E_TOTAL, 16)

  # --- conv1 (1x1 over 2 channels) + ReLU as one K=16 MXU push ----------------
  w_conv = w_ref[pl.ds(R_CONV, 2 * P), pl.ds(0, Y_DIM)]   # (16, 32)
  b_conv = w_ref[pl.ds(R_BCONV, 1), pl.ds(0, Y_DIM)]      # (1, 32)
  yc = jnp.maximum(
      jnp.dot(ne, w_conv, preferred_element_type=jnp.float32) + b_conv, 0.0)

  # --- mlp1: single K=48 dot (yc | state_j), ReLU, then K=64 dot --------------
  feat1 = jnp.concatenate([yc, state_j], axis=-1)         # (E_TOTAL, 48)
  w1a = w_ref[pl.ds(R_W1A, Y_DIM + HIDDEN), :]            # (48, 64)
  b1a = w_ref[pl.ds(R_B1A, 1), :]                         # (1, 64)
  h1 = jnp.maximum(
      jnp.dot(feat1, w1a, preferred_element_type=jnp.float32) + b1a, 0.0)

  w1b = w_ref[pl.ds(R_W1B, MLP1_HID), pl.ds(0, EMB)]      # (64, 32)
  b1b = w_ref[pl.ds(R_B1B, 1), pl.ds(0, EMB)]             # (1, 32)
  emb = jnp.dot(h1, w1b, preferred_element_type=jnp.float32) + b1b  # (E_TOTAL, EMB)

  # --- per-(batch, agent) max over DEG incoming edges --------------------------
  # Edges are slot-major: rows [k*N_TOTAL, (k+1)*N_TOTAL) hold every agent's
  # k-th incoming edge -> contiguous, sublane-aligned slices.
  agg = emb[0:N_TOTAL, :]
  for k in range(1, DEG):
    agg = jnp.maximum(agg, emb[k * N_TOTAL:(k + 1) * N_TOTAL, :])
  # alpha_E already folded into the agg rows of w2a.

  # --- mlp2 on concat(x0, x_last, agg): single K=56 dot, ReLU, K=64 dot --------
  agent = agent_ref[...]                                  # (N_TOTAL, 24)
  feat2 = jnp.concatenate([agent, agg], axis=-1)          # (N_TOTAL, 56)
  w2a = w_ref[pl.ds(R_W2A, NODE_FEAT + HIDDEN + EMB), :]  # (56, 64)  (agg rows pre-scaled by alpha_E)
  b2a = w_ref[pl.ds(R_B2A, 1), :]                         # (1, 64)
  h2 = jnp.maximum(
      jnp.dot(feat2, w2a, preferred_element_type=jnp.float32) + b2a, 0.0)

  w2b = w_ref[pl.ds(R_W2B, MLP2_HID), pl.ds(0, HIDDEN)]   # (64, 16) pre-scaled by alpha_M[0]
  b2b = w_ref[pl.ds(R_B2B, 1), pl.ds(0, HIDDEN)]          # (1, 16)  pre-scaled by alpha_M[0]
  comb = jnp.dot(h2, w2b, preferred_element_type=jnp.float32) + b2b  # (N_TOTAL, 16)

  # dynamic=True: new_x = alpha_M[0]*comb + alpha_M[1]*x_last  (alpha_M[0] folded)
  xl = agent[:, NODE_FEAT:NODE_FEAT + HIDDEN]             # (N_TOTAL, 16)
  out_ref[...] = comb + alpha_ref[0] * xl


# ------------------------------- wrapper -------------------------------------
def auto_igconv_forward(x0, x_last, edge_attr, alpha_E, alpha_M, params, edge_idx):
  (conv_w, conv_b, w1a, b1a, w1b, b1b, w2a, b2a, w2b, b2b) = params

  # ---- host-side edge permutation: slot-major ordering ------------------------
  # (edge_idx must be a concrete/static array; max over a group is order-invariant)
  ei = np.asarray(edge_idx)
  incoming = [np.flatnonzero(ei[:, 1] == a) for a in range(N_AGENT)]
  perm = np.stack([np.array([incoming[a][k] for a in range(N_AGENT)],
                            dtype=np.int32) for k in range(DEG)], axis=0)  # (DEG, N_AGENT)
  src_perm = ei[perm, 0]                                   # (DEG, N_AGENT)

  def to_rows(a):  # (BS, DEG, N_AGENT, F) -> (E_TOTAL, F), row = k*N_TOTAL + b*N_AGENT + a
    return jnp.transpose(a, (1, 0, 2, 3)).reshape(E_TOTAL, a.shape[-1])

  node_j = to_rows(x0[:, src_perm, :])                     # (24, 8)
  state_j = to_rows(x_last[:, src_perm, :])                # (24, 16)
  edge_f = to_rows(edge_attr[:, perm, :])                  # (24, 8)

  edge_slab = jnp.concatenate([node_j, edge_f, state_j], axis=-1)       # (24, 32)
  agent_slab = jnp.concatenate([x0.reshape(N_TOTAL, NODE_FEAT),
                                x_last.reshape(N_TOTAL, HIDDEN)], -1)   # (8, 24)

  # ---- fold conv into a (2*P, Y_DIM) block matrix -----------------------------
  eyeP = jnp.eye(P, dtype=jnp.float32)
  blk0 = jnp.concatenate([eyeP * conv_w[o, 0] for o in range(CONV_OUT)], axis=1)
  blk1 = jnp.concatenate([eyeP * conv_w[o, 1] for o in range(CONV_OUT)], axis=1)
  conv_block = jnp.concatenate([blk0, blk1], axis=0)       # (16, 32)
  b_conv_vec = jnp.repeat(conv_b, P)                       # (32,) channel-major

  # ---- fold alpha_E into w2a (agg rows) and alpha_M[0] into w2b/b2b -----------
  aE = alpha_E[0, 0].astype(jnp.float32)
  aM0 = alpha_M[0].astype(jnp.float32)
  w2a_scaled = jnp.concatenate([w2a[:NODE_FEAT + HIDDEN, :],
                                w2a[NODE_FEAT + HIDDEN:, :] * aE], axis=0)
  w2b_scaled = w2b * aM0
  b2b_scaled = b2b.reshape(-1) * aM0

  # ---- one lane-dense weight + bias slab --------------------------------------
  wslab = jnp.zeros((W_ROWS, W_COLS), jnp.float32)
  wslab = wslab.at[R_CONV:R_CONV + 2 * P, 0:Y_DIM].set(conv_block)
  wslab = wslab.at[R_W1A:R_W1A + Y_DIM + HIDDEN, :].set(w1a)
  wslab = wslab.at[R_W1B:R_W1B + MLP1_HID, 0:EMB].set(w1b)
  wslab = wslab.at[R_W2A:R_W2A + NODE_FEAT + HIDDEN + EMB, :].set(w2a_scaled)
  wslab = wslab.at[R_W2B:R_W2B + MLP2_HID, 0:HIDDEN].set(w2b_scaled)
  wslab = wslab.at[R_BCONV, 0:Y_DIM].set(b_conv_vec)
  wslab = wslab.at[R_B1A, :].set(b1a.reshape(-1))
  wslab = wslab.at[R_B1B, 0:EMB].set(b1b.reshape(-1))
  wslab = wslab.at[R_B2A, :].set(b2a.reshape(-1))
  wslab = wslab.at[R_B2B, 0:HIDDEN].set(b2b_scaled)

  alpha_m1 = alpha_M[1].reshape(1).astype(jnp.float32)     # residual mix scalar

  vmem = pl.BlockSpec(memory_space=pltpu.MemorySpace.VMEM)
  smem = pl.BlockSpec(memory_space=pltpu.MemorySpace.SMEM)

  operands = (edge_slab, agent_slab, wslab, alpha_m1)

  flops = (2 * E_TOTAL * (2 * P) * Y_DIM
           + 2 * E_TOTAL * (Y_DIM + HIDDEN) * MLP1_HID
           + 2 * E_TOTAL * MLP1_HID * EMB
           + 2 * N_TOTAL * (NODE_FEAT + HIDDEN + EMB) * MLP2_HID
           + 2 * N_TOTAL * MLP2_HID * HIDDEN)
  bytes_accessed = int(sum(int(a.size) * int(a.dtype.itemsize) for a in operands)
                       + N_TOTAL * HIDDEN * 4)

  out = pl.pallas_call(
      auto_igconv_kernel,
      out_shape=jax.ShapeDtypeStruct((N_TOTAL, HIDDEN), jnp.float32),
      in_specs=[vmem, vmem, vmem, smem],
      out_specs=vmem,
      cost_estimate=pl.CostEstimate(flops=flops, transcendentals=0,
                                    bytes_accessed=bytes_accessed),
  )(*operands)
  return out.reshape(BS, N_AGENT, HIDDEN)


# ------------------------- pure-JAX reference --------------------------------
def reference_forward(x0, x_last, edge_attr, alpha_E, alpha_M, params,
                      edge_idx, link_to_agent):
  (conv_w, conv_b, w1a, b1a, w1b, b1b, w2a, b2a, w2b, b2b) = params
  bs = x0.shape[0]
  src = edge_idx[:, 0]
  nfj = x0[:, src, :]
  lsj = x_last[:, src, :]
  BE = bs * NUM_EDGE
  x = jnp.concatenate([nfj.reshape(BE, NUM_USER, -1),
                       edge_attr.reshape(BE, NUM_USER, -1)], axis=1)
  xc = x.reshape(BE, 2, NUM_USER, -1)
  y = jnp.einsum('oc,bcuf->bouf', conv_w, xc) + conv_b[None, :, None, None]
  y = jnp.maximum(y, 0.0).reshape(BE, -1)
  feat = jnp.concatenate([y, lsj.reshape(BE, -1)], axis=-1)
  h1 = jnp.maximum(feat @ w1a + b1a.reshape(-1), 0.0)
  emb = (h1 @ w1b + b1b.reshape(-1)).reshape(bs, NUM_EDGE, -1)
  agg = jnp.zeros((bs, N_AGENT, EMB), jnp.float32)
  for i in range(N_AGENT):
    m = jnp.max(emb[:, link_to_agent[i], :], axis=1)
    agg = agg.at[:, i, :].set(alpha_E[:, 0] * m)
  aggcat = jnp.concatenate([x0, x_last, agg], axis=-1).reshape(bs * N_AGENT, -1)
  h2 = jnp.maximum(aggcat @ w2a + b2a.reshape(-1), 0.0)
  comb = (h2 @ w2b + b2b.reshape(-1)).reshape(bs, N_AGENT, -1)
  return alpha_M[0] * comb + alpha_M[1] * x_last


# --------------------------------- main ---------------------------------------
if __name__ == "__main__":
  key = jax.random.PRNGKey(0)
  ks = jax.random.split(key, 16)

  # Graph: fully connected directed edges, grouped by destination agent.
  edges = []
  for m in range(N_AGENT):
    for s in range(N_AGENT):
      if s != m:
        edges.append((s, m))
  edge_idx = jnp.array(edges, dtype=jnp.int32)                 # (E, 2)
  link_to_agent = [jnp.arange(m * DEG, (m + 1) * DEG) for m in range(N_AGENT)]

  # Deterministic synthetic parameters (shapes implied by the module).
  sc = 0.1
  conv_w = sc * jax.random.normal(ks[0], (CONV_OUT, 2), jnp.float32)
  conv_b = sc * jax.random.normal(ks[1], (CONV_OUT,), jnp.float32)
  w1a = sc * jax.random.normal(ks[2], (Y_DIM + HIDDEN, MLP1_HID), jnp.float32)
  b1a = sc * jax.random.normal(ks[3], (1, MLP1_HID), jnp.float32)
  w1b = sc * jax.random.normal(ks[4], (MLP1_HID, EMB), jnp.float32)
  b1b = sc * jax.random.normal(ks[5], (1, EMB), jnp.float32)
  w2a = sc * jax.random.normal(ks[6], (NODE_FEAT + HIDDEN + EMB, MLP2_HID), jnp.float32)
  b2a = sc * jax.random.normal(ks[7], (1, MLP2_HID), jnp.float32)
  w2b = sc * jax.random.normal(ks[8], (MLP2_HID, HIDDEN), jnp.float32)
  b2b = sc * jax.random.normal(ks[9], (1, HIDDEN), jnp.float32)
  params = (conv_w, conv_b, w1a, b1a, w1b, b1b, w2a, b2a, w2b, b2b)

  # Inputs.
  x0 = jax.random.normal(ks[10], (BS, N_AGENT, NODE_FEAT), jnp.float32)
  x_last = jax.random.normal(ks[11], (BS, N_AGENT, HIDDEN), jnp.float32)
  edge_attr = jax.random.normal(ks[12], (BS, NUM_EDGE, EDGE_FEAT), jnp.float32)
  alpha_E = jax.nn.softmax(jax.random.normal(ks[13], (1, 1), jnp.float32), axis=0)
  alpha_M = jax.nn.softmax(jax.random.normal(ks[14], (2,), jnp.float32))

  out = auto_igconv_forward(x0, x_last, edge_attr, alpha_E, alpha_M,
                            params, edge_idx)
  out = jax.block_until_ready(out)

  ref = reference_forward(x0, x_last, edge_attr, alpha_E, alpha_M,
                          params, edge_idx, link_to_agent)
  ref = jax.block_until_ready(ref)

  assert out.shape == (BS, N_AGENT, HIDDEN)
  if not jnp.allclose(out, ref, rtol=1e-4, atol=1e-4):
    raise AssertionError("Pallas kernel output does not match JAX reference")
  print("KERNEL_OK")
</pallas_src>

<mosaic_0001>
module attributes {stable_mosaic.version = 11 : i64} {
  func.func @auto_igconv_kernel(%arg0: memref<24x32xf32, #tpu.memory_space<vmem>>, %arg1: memref<8x24xf32, #tpu.memory_space<vmem>>, %arg2: memref<256x64xf32, #tpu.memory_space<vmem>>, %arg3: memref<1xf32, #tpu.memory_space<smem>>, %arg4: memref<8x16xf32, #tpu.memory_space<vmem>>) attributes {dimension_semantics = [], scalar_prefetch = 0 : i64, scratch_operands = 0 : i64, tpu.core_type = #tpu.core_type<tc>} {
    %c0 = arith.constant 0 : index
    %c0_0 = arith.constant 0 : index
    %0 = vector.load %arg0[%c0, %c0_0] : memref<24x32xf32, #tpu.memory_space<vmem>>, vector<24x32xf32>
    %1 = vector.extract_strided_slice %0 {offsets = [0, 0], sizes = [24, 16], strides = [1, 1]} : vector<24x32xf32> to vector<24x16xf32>
    %2 = vector.extract_strided_slice %0 {offsets = [0, 16], sizes = [24, 16], strides = [1, 1]} : vector<24x32xf32> to vector<24x16xf32>
    %c0_1 = arith.constant 0 : index
    %c0_2 = arith.constant 0 : index
    %3 = vector.load %arg2[%c0_1, %c0_2] : memref<256x64xf32, #tpu.memory_space<vmem>>, vector<16x32xf32>
    %c248 = arith.constant 248 : index
    %c0_3 = arith.constant 0 : index
    %4 = vector.load %arg2[%c248, %c0_3] : memref<256x64xf32, #tpu.memory_space<vmem>>, vector<1x32xf32>
    %cst = arith.constant dense<0.000000e+00> : vector<24x32xf32>
    %5 = tpu.matmul %1, %3, %cst {dimension_numbers = #tpu.dot_dimension_numbers<[1], [0], [0], [1], [0, 0, 1, 1], [], []>} : vector<24x16xf32>, vector<16x32xf32>, vector<24x32xf32> -> vector<24x32xf32>
    %6 = vector.broadcast %4 : vector<1x32xf32> to vector<24x32xf32>
    %7 = arith.addf %5, %6 : vector<24x32xf32>
    %cst_4 = arith.constant 0.000000e+00 : f32
    %8 = vector.broadcast %cst_4 : f32 to vector<24x32xf32>
    %9 = arith.maximumf %7, %8 : vector<24x32xf32>
    %10 = tpu.concatenate %9, %2 in 1 : vector<24x32xf32>, vector<24x16xf32> -> vector<24x48xf32>
    %c16 = arith.constant 16 : index
    %c0_5 = arith.constant 0 : index
    %11 = vector.load %arg2[%c16, %c0_5] : memref<256x64xf32, #tpu.memory_space<vmem>>, vector<48x64xf32>
    %c249 = arith.constant 249 : index
    %c0_6 = arith.constant 0 : index
    %12 = vector.load %arg2[%c249, %c0_6] : memref<256x64xf32, #tpu.memory_space<vmem>>, vector<1x64xf32>
    %cst_7 = arith.constant dense<0.000000e+00> : vector<24x64xf32>
    %13 = tpu.matmul %10, %11, %cst_7 {dimension_numbers = #tpu.dot_dimension_numbers<[1], [0], [0], [1], [0, 0, 1, 1], [], []>} : vector<24x48xf32>, vector<48x64xf32>, vector<24x64xf32> -> vector<24x64xf32>
    %14 = vector.broadcast %12 : vector<1x64xf32> to vector<24x64xf32>
    %15 = arith.addf %13, %14 : vector<24x64xf32>
    %cst_8 = arith.constant 0.000000e+00 : f32
    %16 = vector.broadcast %cst_8 : f32 to vector<24x64xf32>
    %17 = arith.maximumf %15, %16 : vector<24x64xf32>
    %c64 = arith.constant 64 : index
    %c0_9 = arith.constant 0 : index
    %18 = vector.load %arg2[%c64, %c0_9] : memref<256x64xf32, #tpu.memory_space<vmem>>, vector<64x32xf32>
    %c250 = arith.constant 250 : index
    %c0_10 = arith.constant 0 : index
    %19 = vector.load %arg2[%c250, %c0_10] : memref<256x64xf32, #tpu.memory_space<vmem>>, vector<1x32xf32>
    %cst_11 = arith.constant dense<0.000000e+00> : vector<24x32xf32>
    %20 = tpu.matmul %17, %18, %cst_11 {dimension_numbers = #tpu.dot_dimension_numbers<[1], [0], [0], [1], [0, 0, 1, 1], [], []>} : vector<24x64xf32>, vector<64x32xf32>, vector<24x32xf32> -> vector<24x32xf32>
    %21 = vector.broadcast %19 : vector<1x32xf32> to vector<24x32xf32>
    %22 = arith.addf %20, %21 : vector<24x32xf32>
    %23 = vector.extract_strided_slice %22 {offsets = [0, 0], sizes = [8, 32], strides = [1, 1]} : vector<24x32xf32> to vector<8x32xf32>
    %24 = vector.extract_strided_slice %22 {offsets = [8, 0], sizes = [8, 32], strides = [1, 1]} : vector<24x32xf32> to vector<8x32xf32>
    %25 = arith.maximumf %23, %24 : vector<8x32xf32>
    %26 = vector.extract_strided_slice %22 {offsets = [16, 0], sizes = [8, 32], strides = [1, 1]} : vector<24x32xf32> to vector<8x32xf32>
    %27 = arith.maximumf %25, %26 : vector<8x32xf32>
    %c0_12 = arith.constant 0 : index
    %c0_13 = arith.constant 0 : index
    %28 = vector.load %arg1[%c0_12, %c0_13] : memref<8x24xf32, #tpu.memory_space<vmem>>, vector<8x24xf32>
    %29 = tpu.concatenate %28, %27 in 1 : vector<8x24xf32>, vector<8x32xf32> -> vector<8x56xf32>
    %c128 = arith.constant 128 : index
    %c0_14 = arith.constant 0 : index
    %30 = vector.load %arg2[%c128, %c0_14] : memref<256x64xf32, #tpu.memory_space<vmem>>, vector<56x64xf32>
    %c251 = arith.constant 251 : index
    %c0_15 = arith.constant 0 : index
    %31 = vector.load %arg2[%c251, %c0_15] : memref<256x64xf32, #tpu.memory_space<vmem>>, vector<1x64xf32>
    %cst_16 = arith.constant dense<0.000000e+00> : vector<8x64xf32>
    %32 = tpu.matmul %29, %30, %cst_16 {dimension_numbers = #tpu.dot_dimension_numbers<[1], [0], [0], [1], [0, 0, 1, 1], [], []>} : vector<8x56xf32>, vector<56x64xf32>, vector<8x64xf32> -> vector<8x64xf32>
    %33 = vector.broadcast %31 : vector<1x64xf32> to vector<8x64xf32>
    %34 = arith.addf %32, %33 : vector<8x64xf32>
    %cst_17 = arith.constant 0.000000e+00 : f32
    %35 = vector.broadcast %cst_17 : f32 to vector<8x64xf32>
    %36 = arith.maximumf %34, %35 : vector<8x64xf32>
    %c184 = arith.constant 184 : index
    %c0_18 = arith.constant 0 : index
    %37 = vector.load %arg2[%c184, %c0_18] : memref<256x64xf32, #tpu.memory_space<vmem>>, vector<64x16xf32>
    %c252 = arith.constant 252 : index
    %c0_19 = arith.constant 0 : index
    %38 = vector.load %arg2[%c252, %c0_19] : memref<256x64xf32, #tpu.memory_space<vmem>>, vector<1x16xf32>
    %cst_20 = arith.constant dense<0.000000e+00> : vector<8x16xf32>
    %39 = tpu.matmul %36, %37, %cst_20 {dimension_numbers = #tpu.dot_dimension_numbers<[1], [0], [0], [1], [0, 0, 1, 1], [], []>} : vector<8x64xf32>, vector<64x16xf32>, vector<8x16xf32> -> vector<8x16xf32>
    %40 = vector.broadcast %38 : vector<1x16xf32> to vector<8x16xf32>
    %41 = arith.addf %39, %40 : vector<8x16xf32>
    %42 = vector.extract_strided_slice %28 {offsets = [0, 8], sizes = [8, 16], strides = [1, 1]} : vector<8x24xf32> to vector<8x16xf32>
    %c0_21 = arith.constant 0 : index
    %43 = memref.load %arg3[%c0_21] : memref<1xf32, #tpu.memory_space<smem>>
    %44 = vector.broadcast %43 : f32 to vector<8x16xf32>
    %45 = arith.mulf %44, %42 : vector<8x16xf32>
    %46 = arith.addf %41, %45 : vector<8x16xf32>
    %c0_22 = arith.constant 0 : index
    %c0_23 = arith.constant 0 : index
    %47 = vector.load %arg4[%c0_22, %c0_23] : memref<8x16xf32, #tpu.memory_space<vmem>>, vector<8x16xf32>
    tpu.vector_store %arg4[%c0_22, %c0_23], %46 {strides = array<i32>} : memref<8x16xf32, #tpu.memory_space<vmem>>, vector<8x16xf32>,
    return
  }
}

</mosaic_0001>

<bundles_post_ra>
// kernel: tpu_custom_call.1
= control target key start
LH: loop header
LB: loop body
LE: loop exit
PB: predicated region body
PF: predicated region fallthrough
CT: control target
= control target key end

     0   :  { %v776_v2 = vmov 0.0|0.0   ;;  %vm777_vm0 = vmmov 0   ;;  %v778_v4 = vmov 0.0   ;;  %s779_s25 = smov 16   ;;  %vm29_vm1 = vcmask 130048   ;;  %s995_s0 = inlined_call_operand.vmem [shape: f32[24,32], index: 0, kind: input, shape index: {}]   ;;  %s996_s1 = inlined_call_operand.vmem [shape: f32[8,24], index: 1, kind: input, shape index: {}]   ;;  %s997_s2 = inlined_call_operand.vmem [shape: f32[256,64], index: 2, kind: input, shape index: {}]   ;;  %s998_s3 = inlined_call_operand.<no memory space> [shape: f32[1], index: 3, kind: input, shape index: {}]   ;;  %s999_s4 = inlined_call_operand.hbm [shape: f32[8,16], index: 4, kind: output, shape index: {}]  }
   0x1   :  { %v22_v0 = vld [vmem:[%s997_s2] sm:$0xff]  ;;  %v23_v1 = vld [vmem:[%s997_s2 + $0x8] sm:$0xff]  ;;  %700 = vmatprep.subr.bf16.mxu1 %v776_v2  ;;  %609 = vmatprep.mubr.msk.f32.mxu1 %vm777_vm0, %v778_v4  ;;  %v21_v6 = vld [vmem:[%s995_s0 + $0x10] sm:$0xff] }
   0x2   :  { %v701_v3 = vpack.c.bf16 %v23_v1, %v22_v0  ;;  %v19_v5 = vld [vmem:[%s995_s0] sm:$0xff]  ;;  %v135_v7 = vld [vmem:[%s997_s2 + $0x10] sm:$0xff]  ;;  %126 = vrot.lane.b32.xlu1 %v21_v6, %s779_s25  ;;  %v136_v8 = vld [vmem:[%s997_s2 + $0x18] sm:$0xff]  ;;  %712 = vmatprep.subr.bf16.mxu0 %v776_v2 }
   0x3   :  { %122 = vrot.lane.b32.xlu0 %v19_v5, %s779_s25  ;;  %v704_v9 = vpack.c.bf16 %v136_v8, %v135_v7 }
   0x4   :  { %702 = vmatpush3.bf16.msra.mxu1 %v701_v3 }
   0x5   :  { %10 = vsyncpa [#allocation4], 0  ;;  %703 = vmatprep.subr.bf16.mxu1 %v776_v2  ;;  %v137_v10 = vld [vmem:[%s997_s2 + $0x20] sm:$0xff]  ;;  %v138_v11 = vld [vmem:[%s997_s2 + $0x28] sm:$0xff]  ;;  %655 = vmatprep.mubr.msk.f32.mxu0 %vm777_vm0, %v778_v4  ;;  %vm131_vm2 = vcmask 261120   ;;  %vm146_vm3 = vcmask 392192  }
   0x6   :  { %v20_v12 = vld [vmem:[%s995_s0 + $0x8] sm:$0xff]  ;;  %v707_v13 = vpack.c.bf16 %v138_v11, %v137_v10  ;;  %v139_v14 = vld [vmem:[%s997_s2 + $0x30] sm:$0xff]  ;;  %v140_v15 = vld [vmem:[%s997_s2 + $0x38] sm:$0xff]  ;;  %vm252_vm4 = vcmask 523264   ;;  %s780_s6 = smov 24   ;;  %vm349_vm5 = vcmask 195584  }
   0x7   :  { %610 = vmatmul.mubr.msk.f32.vlgmr.msra.gmra.mrb[0].mxu1 %vm29_vm1, %v19_v5  ;;  %124 = vrot.lane.b32.xlu0 %v20_v12, %s779_s25  ;;  %v710_v16 = vpack.c.bf16 %v140_v15, %v139_v14  ;;  %v239_v17 = vld [vmem:[%s997_s2 + $0x40] sm:$0xff]  ;;  %v240_v18 = vld [vmem:[%s997_s2 + $0x48] sm:$0xff]  ;;  %v241_v19 = vld [vmem:[%s997_s2 + $0x50] sm:$0xff]  ;;  %vm363_vm6 = vcmask 457728  }
   0x8   :  { %612 = vmatprep.mubr.msk.f32.mxu1 %vm777_vm0, %v778_v4  ;;  %705 = vmatpush3.bf16.msra.mxu1 %v704_v9  ;;  %v713_v20 = vpack.c.bf16 %v240_v18, %v239_v17  ;;  %v242_v21 = vld [vmem:[%s997_s2 + $0x58] sm:$0xff]  ;;  %v243_v23 = vld [vmem:[%s997_s2 + $0x60] sm:$0xff]  ;;  %v244_v24 = vld [vmem:[%s997_s2 + $0x68] sm:$0xff] }
   0x9   :  { %706 = vmatprep.subr.bf16.mxu1 %v776_v2  ;;  %v716_v22 = vpack.c.bf16 %v242_v21, %v241_v19  ;;  %v719_v25 = vpack.c.bf16 %v244_v24, %v243_v23  ;;  %v547_v26 = vld [vmem:[%s997_s2 + $0xf8] ss:$0 sm:$0xff]  ;;  %v245_v45 = vld [vmem:[%s997_s2 + $0x70] sm:$0xff]  ;;  %v551_v48 = vld [vmem:[%s997_s2 + $0xf9] ss:$0 sm:$0xff] }
   0xa   :  { %714 = vmatpush3.bf16.msra.mxu0 %v713_v20  ;;  %v246_v46 = vld [vmem:[%s997_s2 + $0x78] sm:$0xff]  ;;  %v351_v61 = vld [vmem:[%s997_s2 + $0x80] sm:$0xff]  ;;  %v352_v62 = vld [vmem:[%s997_s2 + $0x88] sm:$0xff] }
   0xb   :  { %613 = vmatmul.mubr.msk.f32.gmra.mrb[2].mxu1 %vm29_vm1, %v20_v12  ;;  %715 = vmatprep.subr.bf16.mxu0 %v776_v2  ;;  %v722_v47 = vpack.c.bf16 %v246_v46, %v245_v45  ;;  %v353_v63 = vld [vmem:[%s997_s2 + $0x90] sm:$0xff]  ;;  %v725_v0 = vpack.c.bf16 %v352_v62, %v351_v61  ;;  %v354_v1 = vld [vmem:[%s997_s2 + $0x98] sm:$0xff]  ;;  %v355_v5 = vld [vmem:[%s997_s2 + $0xa0] sm:$0xff] }
   0xc   :  { %615 = vmatprep.mubr.msk.f32.mxu1 %vm777_vm0, %v778_v4  ;;  %708 = vmatpush3.bf16.msra.mxu1 %v707_v13  ;;  %v728_v3 = vpack.c.bf16 %v354_v1, %v353_v63  ;;  %v357_v8 = vld [vmem:[%s997_s2 + $0xb0] sm:$0xff]  ;;  %v438_v11 = vld [vmem:[%s997_s2 + $0xb8] sm:$0xff]  ;;  %v439_v12 = vld [vmem:[%s997_s2 + $0xc0] sm:$0xff] }
   0xd   :  { %709 = vmatprep.subr.bf16.mxu1 %v776_v2  ;;  %v440_v13 = vld [vmem:[%s997_s2 + $0xc8] sm:$0xff]  ;;  %v734_v14 = vpack.c.bf16 %v439_v12, %v438_v11  ;;  %v441_v15 = vld [vmem:[%s997_s2 + $0xd0] sm:$0xff]  ;;  %v442_v21 = vld [vmem:[%s997_s2 + $0xd8] sm:$0xff] }
   0xe   :  { %717 = vmatpush3.bf16.msra.mxu0 %v716_v22  ;;  %v737_v17 = vpack.c.bf16 %v441_v15, %v440_v13  ;;  %v443_v22 = vld [vmem:[%s997_s2 + $0xe0] sm:$0xff] }
   0xf   :  { %616 = vmatmul.mubr.msk.f32.gmra.mrb[4].mxu1 %vm29_vm1, %v21_v6  ;;  %718 = vmatprep.subr.bf16.mxu0 %v776_v2  ;;  %v356_v6 = vld [vmem:[%s997_s2 + $0xa8] sm:$0xff] }
  0x10   :  { %630 = vmatprep.mubr.msk.f32.mxu1 %vm777_vm0, %v778_v4  ;;  %711 = vmatpush3.bf16.msra.mxu1 %v710_v16  ;;  %v731_v7 = vpack.c.bf16 %v356_v6, %v355_v5 }
  0x11   :  { %724 = vmatprep.subr.bf16.mxu1 %v776_v2 }
  0x12   :  { %720 = vmatpush3.bf16.msra.mxu0 %v719_v25  ;;  %v740_v25 = vpack.c.bf16 %v443_v22, %v442_v21 }
  0x13   :  { %721 = vmatprep.subr.bf16.mxu0 %v776_v2 }
  0x16   :  { %723 = vmatpush3.bf16.msra.mxu0 %v722_v47 }
  0x17   :  { %733 = vmatprep.subr.bf16.mxu0 %v776_v2 }
  0x74   :  { %v127_v42 = vpop.permute.xlu1 %126 }
  0x75   :  { %v123_v28 = vpop.permute.xlu0 %122 }
  0x79   :  { %v125_v36 = vpop.permute.xlu0 %124 }
  0xda   :  { %v105_v27 = vpop.f32.mrb[0].mxu1 }
  0xdb   :  { %v106_v29 = vadd.f32 %v547_v26, %v105_v27  ;;  %v611_v30 = vpop.f32.mrb[1].mxu1 }
  0xdd   :  { %v119_v31 = vmax.f32 %v106_v29, 0.0  ;;  %v344_v29 = vld [vmem:[%s996_s1] sm:$0xff]  ;;  %s781_s1 = smov 120  }
  0xde   :  { %v110_v32 = vpop.f32.mrb[2].mxu1 }
  0xdf   :  { %v132_v33 = vsel %vm131_vm2, %v119_v31, %v123_v28  ;;  %v111_v34 = vadd.f32 %v547_v26, %v110_v32  ;;  %v614_v35 = vpop.f32.mrb[3].mxu1  ;;  %v444_v32 = vld [vmem:[%s997_s2 + $0xe8] sm:$0xff] }
  0xe0   :  { %631 = vmatmul.mubr.msk.f32.vlgmr.msra.gmra.mrb[6].mxu1 %vm146_vm3, %v132_v33  ;;  %v445_v33 = vld [vmem:[%s997_s2 + $0xf0] sm:$0xff] }
  0xe1   :  { %v120_v37 = vmax.f32 %v111_v34, 0.0  ;;  %633 = vmatprep.mubr.msk.f32.mxu1 %vm777_vm0, %v778_v4  ;;  %726 = vmatpush3.bf16.msra.mxu1 %v725_v0  ;;  %v743_v34 = vpack.c.bf16 %v445_v33, %v444_v32 }
  0xe2   :  { %v115_v38 = vpop.f32.mrb[4].mxu1  ;;  %727 = vmatprep.subr.bf16.mxu1 %v776_v2 }
  0xe3   :  { %v133_v39 = vsel %vm131_vm2, %v120_v37, %v125_v36  ;;  %v116_v40 = vadd.f32 %v547_v26, %v115_v38  ;;  %v617_v41 = vpop.f32.mrb[5].mxu1  ;;  %v559_v36 = vld [vmem:[%s997_s2 + $0xfb] ss:$0 sm:$0xff] }
  0xe4   :  { %634 = vmatmul.mubr.msk.f32.gmra.mrb[8].mxu1 %vm146_vm3, %v133_v39  ;;  %v561_v41 = vld [vmem:[%s997_s2 + $0xfc] ss:$0 sm:$0xff] }
  0xe5   :  { %v121_v43 = vmax.f32 %v116_v40, 0.0  ;;  %636 = vmatprep.mubr.msk.f32.mxu1 %vm777_vm0, %v778_v4  ;;  %729 = vmatpush3.bf16.msra.mxu1 %v728_v3 }
  0xe6   :  { %730 = vmatprep.subr.bf16.mxu1 %v776_v2 }
  0xe7   :  { %v134_v44 = vsel %vm131_vm2, %v121_v43, %v127_v42 }
  0xe8   :  { %637 = vmatmul.mubr.msk.f32.gmra.mrb[10].mxu1 %vm146_vm3, %v134_v44 }
  0xe9   :  { %678 = vmatprep.mubr.msk.f32.mxu1 %vm777_vm0, %v778_v4  ;;  %732 = vmatpush3.bf16.msra.mxu1 %v731_v7 }
  0xea   :  { %676 = vmatprep.subr.mxu1 %v778_v4 }
  0xed   :  { %677 = vmatpush3.msra.mxu1 %v357_v8 }
 0x1b3   :  { %v222_v49 = vpop.f32.mrb[6].mxu1 }
 0x1b4   :  { %v223_v50 = vadd.f32 %v551_v48, %v222_v49  ;;  %v632_v51 = vpop.f32.mrb[7].mxu1 }
 0x1b6   :  { %v236_v52 = vmax.f32 %v223_v50, 0.0 }
 0x1b7   :  { %v227_v53 = vpop.f32.mrb[8].mxu1 }
 0x1b8   :  { %v228_v54 = vadd.f32 %v551_v48, %v227_v53  ;;  %v635_v55 = vpop.f32.mrb[9].mxu1  ;;  %656 = vmatmul.mubr.msk.f32.vlgmr.msra.gmra.mrb[0].mxu0 %vm252_vm4, %v236_v52 }
 0x1b9   :  { %658 = vmatprep.mubr.msk.f32.mxu0 %vm777_vm0, %v778_v4  ;;  %735 = vmatpush3.bf16.msra.mxu0 %v734_v14 }
 0x1ba   :  { %v237_v56 = vmax.f32 %v228_v54, 0.0  ;;  %736 = vmatprep.subr.bf16.mxu0 %v776_v2 }
 0x1bb   :  { %v232_v57 = vpop.f32.mrb[10].mxu1 }
 0x1bc   :  { %v233_v58 = vadd.f32 %v551_v48, %v232_v57  ;;  %v638_v59 = vpop.f32.mrb[11].mxu1  ;;  %659 = vmatmul.mubr.msk.f32.gmra.mrb[2].mxu0 %vm252_vm4, %v237_v56 }
 0x1bd   :  { %661 = vmatprep.mubr.msk.f32.mxu0 %vm777_vm0, %v778_v4  ;;  %738 = vmatpush3.bf16.msra.mxu0 %v737_v17 }
 0x1be   :  { %v238_v60 = vmax.f32 %v233_v58, 0.0  ;;  %739 = vmatprep.subr.bf16.mxu0 %v776_v2 }
 0x1c0   :  { %662 = vmatmul.mubr.msk.f32.gmra.mrb[4].mxu0 %vm252_vm4, %v238_v60 }
 0x1c1   :  { %697 = vmatprep.mubr.msk.f32.mxu0 %vm777_vm0, %v778_v4  ;;  %v555_v4 = vld [vmem:[%s997_s2 + $0xfa] ss:$0 sm:$0xff]  ;;  %741 = vmatpush3.bf16.msra.mxu0 %v740_v25 }
 0x1c2   :  { %742 = vmatprep.subr.bf16.mxu0 %v776_v2  ;;  %v525_v2 = vstv %s998_s3  ;;  %s782_s3 = smov [#allocation3]  }
 0x1c3   :  { %v526_v35 = vmul.f32 %v525_v2, %v344_v29  ;;  %s539_s18 = sshll.u32 %s782_s3, 4  ;;  %s540_s18 = int_to_ptr.vmem [resolvable:$true] %s539_s18 }
 0x1c4   :  { %s752_s19 = scalar_lea.vmem %s540_s18, 128  ;;  %p757_p1 = scmp.lt.s32.totalorder %s540_s18, %s540_s18 }
 0x1c5   :  { %744 = vmatpush3.bf16.msra.mxu0 %v743_v34  ;;  %528 = vrot.lane.b32.xlu0 %v526_v35, %s781_s1  ;;  %p753_p0 = scmp.ne.s32.totalorder %s540_s18, %s752_s19  ;;  %p758_p2 = scmp.lt.s32.totalorder %s752_s19, %s752_s19 }
 0x1c7   :  { %p759_p3 = por %p758_p2, %p757_p1 }
 0x1c9   :  { %p760_p4 = pnand %p759_p3, %p753_p0 }
 0x237   :  { %v529_v43 = vpop.permute.xlu0 %528 }
 0x28b   :  { %v328_v9 = vpop.f32.mrb[0].mxu0 }
 0x28c   :  { %v657_v10 = vpop.f32.mrb[1].mxu0  ;;  %v329_v18 = vadd.f32 %v555_v4, %v328_v9 }
 0x28f   :  { %v333_v16 = vpop.f32.mrb[2].mxu0 }
 0x290   :  { %v334_v19 = vadd.f32 %v555_v4, %v333_v16  ;;  %v660_v20 = vpop.f32.mrb[3].mxu0 }
 0x292   :  { %v342_v23 = vmax.f32 %v329_v18, %v334_v19 }
 0x293   :  { %v338_v24 = vpop.f32.mrb[4].mxu0 }
 0x294   :  { %v339_v26 = vadd.f32 %v555_v4, %v338_v24  ;;  %v663_v27 = vpop.f32.mrb[5].mxu0 }
 0x296   :  { %v343_v28 = vmax.f32 %v342_v23, %v339_v26 }
 0x298   :  { %346 = vrot.lane.b32.xlu1 %v343_v28, %s780_s6 }
 0x30a   :  { %v347_v30 = vpop.permute.xlu1 %346 }
 0x30b   :  { %v350_v31 = vsel %vm349_vm5, %v344_v29, %v347_v30 }
 0x30c   :  { %679 = vmatmul.mubr.msk.f32.vlgmr.msra.gmra.mrb[12].mxu1 %vm363_vm6, %v350_v31 }
 0x3df   :  { %v433_v37 = vpop.f32.mrb[12].mxu1 }
 0x3e0   :  { %v434_v38 = vadd.f32 %v559_v36, %v433_v37  ;;  %v680_v39 = vpop.f32.mrb[13].mxu1 }
 0x3e2   :  { %v437_v40 = vmax.f32 %v434_v38, 0.0 }
 0x3e4   :  { %698 = vmatmul.mubr.msk.f32.vlgmr.msra.gmra.mrb[6].mxu0 %vm252_vm4, %v437_v40 }
 0x4b7   :  { %v520_v42 = vpop.f32.mrb[6].mxu0 }
 0x4b8   :  { %v521_v44 = vadd.f32 %v561_v41, %v520_v42  ;;  %v699_v45 = vpop.f32.mrb[7].mxu0 }
 0x4ba   :  { %v531_v46 = vadd.f32 %v529_v43, %v521_v44 }
 0x4bc   :  { %532 = vst.msk [vmem:[#allocation3] sm:$0xff] %vm29_vm1, %v531_v46 }
 0x4bd   :  { %763 = shalt.err (!%p760_p4)
}
 0x4be   :  { %s764_s2 = scalar_lea.hbm %s999_s4, 128 }
 0x4bf   :  { %p765_p5 = scmp.ne.s32.totalorder %s999_s4, %s764_s2  ;;  %p768_p6 = scmp.lt.u32.totalorder %s764_s2, %s999_s4 }
 0x4c1   :  { %p770_p7 = pnand %p768_p6, %p765_p5 }
 0x4c3   :  { %773 = shalt.err (!%p770_p7)
}
 0x4c4   :  { %542 = dma.vmem_to_hbm [thread:$0]  %s540_s18, 128, %s999_s4, [#allocation4]  }
 0x4c5   :  { %774 = dma.done.wait [#allocation4], 128  }
 0x4c6   :  { %775 = vsyncadd [#allocation4], 4294967168 }
 0x4c7   :  { %546 = vsyncpa [#allocation4], 1 }

</bundles_post_ra>
